<compile_context>
chip_gen: v7x
topology: tpu7x:2x2x1
jax: 0.10.0
libtpu: 0.0.40
codegen_flags: <defaults>
</compile_context>

<pallas_src>
import functools

import jax
import jax.numpy as jnp
from jax.experimental import pallas as pl
from jax.experimental.pallas import tpu as pltpu


# --------------------------------------------------------------------------- #
# Helpers
# --------------------------------------------------------------------------- #
def _round_up(x: int, m: int) -> int:
    return ((x + m - 1) // m) * m


def _device_kind() -> str:
    try:
        return jax.devices()[0].device_kind.lower()
    except Exception:
        return ""


def _is_v5e(kind: str) -> bool:
    return ("v5 lite" in kind) or ("v5e" in kind) or ("v5lite" in kind)


def _is_v7(kind: str) -> bool:
    return "v7" in kind


def _device_vmem_bytes() -> int:
    # Capability probe only — fine to fall back on a conservative guess.
    try:
        info = pltpu.get_tpu_info()
        cap = int(getattr(info, "vmem_capacity_bytes"))
        if cap > 0:
            return cap
    except Exception:
        pass
    return (64 << 20) if _is_v7(_device_kind()) else (128 << 20)


def _preferred_tile_b(B: int) -> int:
    kind = _device_kind()
    if _is_v5e(kind):
        # 128 matches the 4x128^2 MXU; 256 halves grid-step overhead for big B.
        return 256 if B >= 1024 else 128
    if _is_v7(kind):
        return 256
    # v6e (and default): bigger tiles amortize the ~0.35us per-grid-step cost.
    return 512 if B >= 2048 else 256


def _choose_tile_b(B: int, preferred: int) -> int:
    # Largest tile (multiple of 16 for bf16 sublane packing) with <=12.5% pad.
    B16 = _round_up(max(B, 1), 16)
    for c in (512, 256, 128, 64, 32, 16):
        if c > preferred:
            continue
        pad = (-B16) % c
        if pad <= max(B16 // 8, 0) or pad <= 16:
            return c
    return 16


def _choose_tile_n(hidden: int, grid_b: int, resident_bytes: int,
                   vmem_bytes: int) -> int:
    # Split W2/b2/out columns when (a) v7x's two TensorCores would otherwise be
    # under-occupied by a 1-step batch grid, or (b) resident W2 would not fit
    # comfortably in per-core VMEM.  tile_n must be a multiple of 128.
    if hidden % 256 != 0:
        return hidden
    want_split = (_is_v7(_device_kind()) and grid_b < 2) or \
                 (resident_bytes > 0.4 * vmem_bytes)
    if not want_split:
        return hidden
    tile_n = hidden // 2
    # Keep shrinking while W2 column tiles are still very large for VMEM.
    while tile_n % 256 == 0 and tile_n > 512 and \
            (hidden * tile_n * 2) > 0.35 * vmem_bytes:
        tile_n //= 2
    return max(tile_n, 128)


def _supports_buffered_one() -> bool:
    if not hasattr(pl, "Buffered"):
        return False
    try:
        pl.BlockSpec((8, 128), lambda i: (0, 0), pipeline_mode=pl.Buffered(1))
        return True
    except TypeError:
        return False


# --------------------------------------------------------------------------- #
# Kernel
# --------------------------------------------------------------------------- #
def mlp_embedder_kernel(x_ref, w1_ref, b1_ref, w2_ref, b2_ref, o_ref, *,
                        compute_dtype):
    # in_layer: cast the x tile to the MXU compute dtype in-kernel (VPU work,
    # hidden under the matmul); accumulate in f32 on the MXU.
    x = x_ref[...].astype(compute_dtype)
    h = jnp.dot(x, w1_ref[...], preferred_element_type=jnp.float32)
    h = h + b1_ref[...]                       # bias add in f32 (VPU)
    h = h * jax.nn.sigmoid(h)                 # SiLU; sigmoid -> EUP slot
    # out_layer: cast the intermediate back to bf16 for the MXU.
    o = jnp.dot(h.astype(w2_ref.dtype), w2_ref[...],
                preferred_element_type=jnp.float32)
    o = o + b2_ref[...]
    o_ref[...] = o.astype(o_ref.dtype)


# --------------------------------------------------------------------------- #
# Wrapper
# --------------------------------------------------------------------------- #
def prepare_mlp_embedder_params(w1, b1, w2, b2, compute_dtype=jnp.bfloat16):
    """One-time parameter setup.

    Weights pre-transposed to [in, out] and cast ONCE to the MXU compute dtype
    so no per-call f32->bf16 weight passes hit HBM; biases stay f32.
    """
    hidden = w1.shape[1]
    return (jnp.asarray(w1, compute_dtype),
            jnp.asarray(b1, jnp.float32).reshape(1, hidden),
            jnp.asarray(w2, compute_dtype),
            jnp.asarray(b2, jnp.float32).reshape(1, hidden))


def mlp_embedder(x, w1, b1, w2, b2, *, tile_b=None, tile_n=None,
                 compute_dtype=jnp.bfloat16, out_dtype=None,
                 single_buffer_weights=True):
    """x: [B, in_dim]; w1: [in_dim, hidden]; b1: [hidden]/[1,hidden];
       w2: [hidden, hidden]; b2: [hidden]/[1,hidden]  ->  [B, hidden]

    Pass weights already in `compute_dtype` (see prepare_mlp_embedder_params);
    pass out_dtype=jnp.bfloat16 if the consumer tolerates it (halves writeback).
    """
    B, in_dim = x.shape
    hidden = w1.shape[1]
    out_dtype = x.dtype if out_dtype is None else jnp.dtype(out_dtype)

    # Correctness fallback only: if weights still arrive in another dtype we
    # cast them here (costs an extra HBM pass per call — prefer the prepare fn).
    if w1.dtype != compute_dtype:
        w1 = w1.astype(compute_dtype)
    if w2.dtype != compute_dtype:
        w2 = w2.astype(compute_dtype)
    b1 = jnp.asarray(b1, jnp.float32).reshape(1, hidden)
    b2 = jnp.asarray(b2, jnp.float32).reshape(1, hidden)

    bpe_c = jnp.dtype(compute_dtype).itemsize
    bpe_x = jnp.dtype(x.dtype).itemsize
    bpe_o = jnp.dtype(out_dtype).itemsize
    vmem_bytes = _device_vmem_bytes()

    # ---- batch tiling (x stays in native dtype; pad only when needed) ----- #
    if tile_b is None:
        tile_b = _choose_tile_b(B, _preferred_tile_b(B))
    tile_b = max(16, _round_up(min(tile_b, _round_up(B, 16)), 16))
    B_pad = _round_up(B, tile_b)
    grid_b = B_pad // tile_b
    x_p = jnp.pad(x, ((0, B_pad - B), (0, 0))) if B_pad != B else x

    # ---- hidden-column (N) tiling ---------------------------------------- #
    resident_all = (in_dim * hidden + hidden * hidden) * bpe_c + 2 * hidden * 4
    if tile_n is None:
        tile_n = _choose_tile_n(hidden, grid_b, resident_all, vmem_bytes)
    assert hidden % tile_n == 0 and (tile_n == hidden or tile_n % 128 == 0), \
        "tile_n must divide hidden and be a multiple of 128"
    grid_n = hidden // tile_n

    buffered_one = bool(single_buffer_weights) and _supports_buffered_one()

    # ---- VMEM budget: 1x resident + ~1.25x pipelined, clamped to device --- #
    w1_bytes = (in_dim * hidden * bpe_c + hidden * 4) * (1 if buffered_one else 2)
    w2_bufs = 1 if (buffered_one and grid_n == 1) else 2
    w2_bytes = (hidden * tile_n * bpe_c + tile_n * 4) * w2_bufs
    pipelined = 2 * tile_b * in_dim * bpe_x + 2 * tile_b * tile_n * bpe_o
    interm = tile_b * hidden * 4 + tile_b * tile_n * 4      # f32 h and o
    budget = int(w1_bytes + w2_bytes + 1.25 * (pipelined + interm))
    vmem_limit = int(min(max(budget, 32 << 20), int(0.85 * vmem_bytes)))

    # ---- cost estimate (advisory) ----------------------------------------- #
    flops = 2 * B_pad * in_dim * hidden * grid_n + 2 * B_pad * hidden * hidden
    bytes_accessed = (B_pad * in_dim * bpe_x * grid_n          # x (re-read per N tile)
                      + (in_dim * hidden + hidden * hidden) * bpe_c   # W1, W2
                      + 2 * hidden * 4                          # b1, b2
                      + B_pad * hidden * bpe_o)                 # out
    cost = pl.CostEstimate(flops=int(flops),
                           transcendentals=int(B_pad * hidden * grid_n),
                           bytes_accessed=int(bytes_accessed))

    # ---- BlockSpecs: N axis outermost so each W2 column block loads once --- #
    def _spec(block_shape, index_map, resident):
        if resident and buffered_one:
            return pl.BlockSpec(block_shape, index_map,
                                pipeline_mode=pl.Buffered(1))
        return pl.BlockSpec(block_shape, index_map)

    in_specs = [
        pl.BlockSpec((tile_b, in_dim), lambda j, i: (i, 0)),           # x tile
        _spec((in_dim, hidden), lambda j, i: (0, 0), True),            # W1
        _spec((1, hidden),      lambda j, i: (0, 0), True),            # b1
        _spec((hidden, tile_n), lambda j, i: (0, j), grid_n == 1),     # W2 cols
        _spec((1, tile_n),      lambda j, i: (0, j), grid_n == 1),     # b2 cols
    ]
    out_spec = pl.BlockSpec((tile_b, tile_n), lambda j, i: (i, j))

    kernel = functools.partial(mlp_embedder_kernel, compute_dtype=compute_dtype)
    out = pl.pallas_call(
        kernel,
        out_shape=jax.ShapeDtypeStruct((B_pad, hidden), out_dtype),
        grid_spec=pltpu.PrefetchScalarGridSpec(
            num_scalar_prefetch=0,
            grid=(grid_n, grid_b),
            in_specs=in_specs,
            out_specs=out_spec,
        ),
        compiler_params=pltpu.CompilerParams(
            dimension_semantics=("parallel", "parallel"),
            vmem_limit_bytes=vmem_limit,
        ),
        cost_estimate=cost,
    )(x_p, w1, b1, w2, b2)

    return out[:B] if B_pad != B else out


def mlp_embedder_ref(x, w1, b1, w2, b2):
    h = x @ w1 + jnp.reshape(b1, (1, -1))
    h = h * jax.nn.sigmoid(h)
    return h @ w2 + jnp.reshape(b2, (1, -1))


# --------------------------------------------------------------------------- #
# Self-test
# --------------------------------------------------------------------------- #
if __name__ == "__main__":
    # Small, lane-aligned shapes consistent with MLPEmbedder(in_dim, hidden).
    B, IN_DIM, HIDDEN = 64, 128, 256

    key = jax.random.PRNGKey(0)
    kx, kw1, kb1, kw2, kb2 = jax.random.split(key, 5)

    x = jax.random.normal(kx, (B, IN_DIM), dtype=jnp.float32)
    # PyTorch nn.Linear weights, pre-transposed to [in, out].
    w1_f32 = jax.random.normal(kw1, (IN_DIM, HIDDEN), dtype=jnp.float32) * 0.05
    b1_f32 = jax.random.normal(kb1, (HIDDEN,), dtype=jnp.float32) * 0.05
    w2_f32 = jax.random.normal(kw2, (HIDDEN, HIDDEN), dtype=jnp.float32) * 0.05
    b2_f32 = jax.random.normal(kb2, (HIDDEN,), dtype=jnp.float32) * 0.05

    # One-time setup cast (removes per-call f32->bf16 weight passes).
    w1, b1, w2, b2 = prepare_mlp_embedder_params(w1_f32, b1_f32, w2_f32, b2_f32)

    ref = mlp_embedder_ref(x, w1_f32, b1_f32, w2_f32, b2_f32)

    # 1) default config (resident weights, batch-tiled grid).
    out = jax.block_until_ready(mlp_embedder(x, w1, b1, w2, b2))
    assert out.shape == (B, HIDDEN)
    assert jnp.allclose(out.astype(jnp.float32), ref, atol=3e-2, rtol=3e-2), \
        "mismatch vs reference (default config)"

    # 2) N-split path (v7x-style column tiling of W2/out) with bf16 output.
    out2 = jax.block_until_ready(
        mlp_embedder(x, w1, b1, w2, b2, tile_n=128, out_dtype=jnp.bfloat16))
    assert out2.shape == (B, HIDDEN)
    assert jnp.allclose(out2.astype(jnp.float32), ref, atol=5e-2, rtol=5e-2), \
        "mismatch vs reference (N-split config)"

    print("KERNEL_OK")
</pallas_src>

<mosaic_0001>
module attributes {stable_mosaic.version = 11 : i64} {
  func.func @mlp_embedder_kernel(%arg0: i32, %arg1: i32, %arg2: memref<64x128xf32, #tpu.memory_space<vmem>>, %arg3: memref<128x256xbf16, #tpu.memory_space<vmem>>, %arg4: memref<1x256xf32, #tpu.memory_space<vmem>>, %arg5: memref<256x256xbf16, #tpu.memory_space<vmem>>, %arg6: memref<1x256xf32, #tpu.memory_space<vmem>>, %arg7: memref<64x256xf32, #tpu.memory_space<vmem>>) attributes {dimension_semantics = [#tpu.dimension_semantics<parallel>, #tpu.dimension_semantics<parallel>], iteration_bounds = array<i64: 1, 1>, scalar_prefetch = 0 : i64, scratch_operands = 0 : i64, tpu.core_type = #tpu.core_type<tc>, window_params = [{transform_indices = @transform_0, window_bounds = array<i64: 64, 128>}, {pipeline_mode = #tpu.pipeline_mode<synchronous>, transform_indices = @transform_1, window_bounds = array<i64: 128, 256>}, {pipeline_mode = #tpu.pipeline_mode<synchronous>, transform_indices = @transform_2, window_bounds = array<i64: 1, 256>}, {pipeline_mode = #tpu.pipeline_mode<synchronous>, transform_indices = @transform_3, window_bounds = array<i64: 256, 256>}, {pipeline_mode = #tpu.pipeline_mode<synchronous>, transform_indices = @transform_4, window_bounds = array<i64: 1, 256>}, {transform_indices = @transform_5, window_bounds = array<i64: 64, 256>}]} {
    %c0 = arith.constant 0 : index
    %c0_0 = arith.constant 0 : index
    %0 = vector.load %arg2[%c0, %c0_0] : memref<64x128xf32, #tpu.memory_space<vmem>>, vector<64x128xf32>
    %1 = arith.truncf %0 : vector<64x128xf32> to vector<64x128xbf16>
    %c0_1 = arith.constant 0 : index
    %c0_2 = arith.constant 0 : index
    %2 = vector.load %arg3[%c0_1, %c0_2] : memref<128x256xbf16, #tpu.memory_space<vmem>>, vector<128x256xbf16>
    %cst = arith.constant dense<0.000000e+00> : vector<64x256xf32>
    %3 = tpu.matmul %1, %2, %cst {dimension_numbers = #tpu.dot_dimension_numbers<[1], [0], [0], [1], [0, 0, 1, 1], [], []>} : vector<64x128xbf16>, vector<128x256xbf16>, vector<64x256xf32> -> vector<64x256xf32>
    %c0_3 = arith.constant 0 : index
    %c0_4 = arith.constant 0 : index
    %4 = vector.load %arg4[%c0_3, %c0_4] : memref<1x256xf32, #tpu.memory_space<vmem>>, vector<1x256xf32>
    %5 = vector.broadcast %4 : vector<1x256xf32> to vector<64x256xf32>
    %6 = arith.addf %3, %5 : vector<64x256xf32>
    %7 = arith.negf %6 : vector<64x256xf32>
    %8 = math.exp %7 : vector<64x256xf32>
    %cst_5 = arith.constant 1.000000e+00 : f32
    %9 = vector.broadcast %cst_5 : f32 to vector<64x256xf32>
    %10 = arith.addf %9, %8 : vector<64x256xf32>
    %11 = arith.divf %9, %10 : vector<64x256xf32>
    %12 = arith.mulf %6, %11 : vector<64x256xf32>
    %13 = arith.truncf %12 : vector<64x256xf32> to vector<64x256xbf16>
    %c0_6 = arith.constant 0 : index
    %c0_7 = arith.constant 0 : index
    %14 = vector.load %arg5[%c0_6, %c0_7] : memref<256x256xbf16, #tpu.memory_space<vmem>>, vector<256x256xbf16>
    %cst_8 = arith.constant dense<0.000000e+00> : vector<64x256xf32>
    %15 = tpu.matmul %13, %14, %cst_8 {dimension_numbers = #tpu.dot_dimension_numbers<[1], [0], [0], [1], [0, 0, 1, 1], [], []>} : vector<64x256xbf16>, vector<256x256xbf16>, vector<64x256xf32> -> vector<64x256xf32>
    %c0_9 = arith.constant 0 : index
    %c0_10 = arith.constant 0 : index
    %16 = vector.load %arg6[%c0_9, %c0_10] : memref<1x256xf32, #tpu.memory_space<vmem>>, vector<1x256xf32>
    %17 = vector.broadcast %16 : vector<1x256xf32> to vector<64x256xf32>
    %18 = arith.addf %15, %17 : vector<64x256xf32>
    %c0_11 = arith.constant 0 : index
    %c0_12 = arith.constant 0 : index
    %19 = vector.load %arg7[%c0_11, %c0_12] : memref<64x256xf32, #tpu.memory_space<vmem>>, vector<64x256xf32>
    tpu.vector_store %arg7[%c0_11, %c0_12], %18 {strides = array<i32>} : memref<64x256xf32, #tpu.memory_space<vmem>>, vector<64x256xf32>,
    return
  }
  func.func @transform_0(%arg0: i32, %arg1: i32) -> (i32, i32) {
    %c0_i32 = arith.constant 0 : i32
    %c0_i32_0 = arith.constant 0 : i32
    return %arg1, %c0_i32 : i32, i32
  }
  func.func @transform_1(%arg0: i32, %arg1: i32) -> (i32, i32) {
    %c0_i32 = arith.constant 0 : i32
    %c0_i32_0 = arith.constant 0 : i32
    %c0_i32_1 = arith.constant 0 : i32
    return %c0_i32, %c0_i32_0 : i32, i32
  }
  func.func @transform_2(%arg0: i32, %arg1: i32) -> (i32, i32) {
    %c0_i32 = arith.constant 0 : i32
    %c0_i32_0 = arith.constant 0 : i32
    %c0_i32_1 = arith.constant 0 : i32
    return %c0_i32, %c0_i32_0 : i32, i32
  }
  func.func @transform_3(%arg0: i32, %arg1: i32) -> (i32, i32) {
    %c0_i32 = arith.constant 0 : i32
    %c0_i32_0 = arith.constant 0 : i32
    return %c0_i32, %arg0 : i32, i32
  }
  func.func @transform_4(%arg0: i32, %arg1: i32) -> (i32, i32) {
    %c0_i32 = arith.constant 0 : i32
    %c0_i32_0 = arith.constant 0 : i32
    return %c0_i32, %arg0 : i32, i32
  }
  func.func @transform_5(%arg0: i32, %arg1: i32) -> (i32, i32) {
    %c0_i32 = arith.constant 0 : i32
    return %arg1, %arg0 : i32, i32
  }
}

</mosaic_0001>

<bundles_post_ra>
// kernel: tpu_custom_call.1
= control target key start
LH: loop header
LB: loop body
LE: loop exit
PB: predicated region body
PF: predicated region fallthrough
CT: control target
= control target key end

     0   :  { %10 = vsyncpa [#allocation3], 0  ;;  %s1199_s0 = inlined_call_operand.hbm [shape: f32[64,128], index: 0, kind: input, shape index: {}]   ;;  %s1200_s1 = inlined_call_operand.hbm [shape: bf16[128,256], index: 1, kind: input, shape index: {}]   ;;  %s1201_s2 = inlined_call_operand.vmem [shape: f32[1,256], index: 2, kind: input, shape index: {}]   ;;  %s1202_s3 = inlined_call_operand.hbm [shape: bf16[256,256], index: 3, kind: input, shape index: {}]   ;;  %s1203_s4 = inlined_call_operand.vmem [shape: f32[1,256], index: 4, kind: input, shape index: {}]   ;;  %s1204_s5 = inlined_call_operand.hbm [shape: f32[64,256], index: 5, kind: output, shape index: {}]  }
   0x1   :  { %11 = vsyncpa [#allocation6], 0 }
   0x2   :  { %12 = vsyncpa [#allocation4], 0  ;;  %s990_s18 = smov [#allocation5]   ;;  %s991_s20 = smov [#allocation2]  }
   0x3   :  { %s30_s19 = sshll.u32 %s990_s18, 4  ;;  %s18_s21 = sshll.u32 %s991_s20, 4  ;;  %s31_s19 = int_to_ptr.vmem [resolvable:$true] %s30_s19  ;;  %s1029_s21 = int_to_ptr.vmem [resolvable:$true] %s18_s21 }
   0x4   :  { %s896_s24 = scalar_lea.hbm %s1200_s1, 2048 }
   0x5   :  { %p897_p0 = scmp.ne.s32.totalorder %s1200_s1, %s896_s24  ;;  %p900_p1 = scmp.lt.u32.totalorder %s896_s24, %s1200_s1 }
   0x7   :  { %p902_p2 = pnand %p900_p1, %p897_p0 }
   0x9   :  { %905 = shalt.err (!%p902_p2)
}
   0xa   :  { %s906_s29 = scalar_lea.vmem %s31_s19, 2048  ;;  %p911_p4 = scmp.lt.s32.totalorder %s31_s19, %s31_s19 }
   0xb   :  { %p907_p3 = scmp.ne.s32.totalorder %s31_s19, %s906_s29  ;;  %p912_p5 = scmp.lt.s32.totalorder %s906_s29, %s906_s29 }
   0xd   :  { %p913_p6 = por %p912_p5, %p911_p4 }
   0xf   :  { %p914_p7 = pnand %p913_p6, %p907_p3 }
  0x11   :  { %917 = shalt.err (!%p914_p7)
}
  0x12   :  { %s992_s30 = smov 128   ;;  %s993_s6 = smov 8  }
  0x13   :  { %36 = dma.hbm_to_vmem [thread:$0]  %s1200_s1, 2048, %s31_s19, [#allocation6], %s992_s30, %s992_s30, %s993_s6  }
  0x14   :  { %s918_s11 = scalar_lea.hbm %s1199_s0, 1024 }
  0x15   :  { %p919_p8 = scmp.ne.s32.totalorder %s1199_s0, %s918_s11  ;;  %p922_p9 = scmp.lt.u32.totalorder %s918_s11, %s1199_s0 }
  0x17   :  { %p924_p10 = pnand %p922_p9, %p919_p8 }
  0x19   :  { %927 = shalt.err (!%p924_p10)
}
  0x1a   :  { %s928_s16 = scalar_lea.vmem %s1029_s21, 1024  ;;  %p933_p12 = scmp.lt.s32.totalorder %s1029_s21, %s1029_s21 }
  0x1b   :  { %p929_p11 = scmp.ne.s32.totalorder %s1029_s21, %s928_s16  ;;  %p934_p13 = scmp.lt.s32.totalorder %s928_s16, %s928_s16 }
  0x1d   :  { %p935_p0 = por %p934_p13, %p933_p12 }
  0x1f   :  { %p936_p1 = pnand %p935_p0, %p929_p11 }
  0x21   :  { %939 = shalt.err (!%p936_p1)
}
  0x22   :  { %24 = dma.hbm_to_vmem [thread:$0]  %s1199_s0, 1024, %s1029_s21, [#allocation3], %s992_s30, %s992_s30, %s993_s6  }
  0x23   :  { %s994_s18 = smov [#allocation7]   ;;  %s940_s23 = scalar_lea.hbm %s1202_s3, 4096 }
  0x24   :  { %s44_s19 = sshll.u32 %s994_s18, 4  ;;  %p941_p2 = scmp.ne.s32.totalorder %s1202_s3, %s940_s23  ;;  %s45_s19 = int_to_ptr.vmem [resolvable:$true] %s44_s19 }
  0x25   :  { %p944_p3 = scmp.lt.u32.totalorder %s940_s23, %s1202_s3 }
  0x27   :  { %p946_p4 = pnand %p944_p3, %p941_p2 }
  0x29   :  { %949 = shalt.err (!%p946_p4)
}
  0x2a   :  { %s950_s28 = scalar_lea.vmem %s45_s19, 4096  ;;  %p955_p6 = scmp.lt.s32.totalorder %s45_s19, %s45_s19 }
  0x2b   :  { %p951_p5 = scmp.ne.s32.totalorder %s45_s19, %s950_s28  ;;  %p956_p7 = scmp.lt.s32.totalorder %s950_s28, %s950_s28 }
  0x2d   :  { %p957_p8 = por %p956_p7, %p955_p6 }
  0x2f   :  { %p958_p9 = pnand %p957_p8, %p951_p5 }
  0x31   :  { %961 = shalt.err (!%p958_p9)
}
  0x32   :  { %50 = dma.hbm_to_vmem [thread:$0]  %s1202_s3, 4096, %s45_s19, [#allocation6], %s992_s30, %s992_s30, %s993_s6  }
  0x33   :  { %984 = dma.done.wait [#allocation3], 1024  }
  0x34   :  { %985 = vsyncadd [#allocation3], 4294966272 }
  0x35   :  { %986 = dma.done.wait [#allocation6], 6144  }
  0x36   :  { %987 = vsyncadd [#allocation6], 4294961152  ;;  %v995_v0 = vmov 0   ;;  %v760_v1 = vld [vmem:[#allocation5 + $0x4] ss:$8 sps:$4 sm:$0xff]   ;;  %v65_v33 = vld [vmem:[#allocation2 + $0x10] sm:$0xff]  ;;  %v93_v61 = vlaneseq }
  0x37   :  { %215 = vmatprep.mubr.bf16.mxu0 %v995_v0  ;;  %v762_v2 = vld [vmem:[#allocation5] ss:$8 sps:$4 sm:$0xff]   ;;  %183 = vmatprep.subr.bf16.mxu0 %v760_v1  ;;  %v763_v3 = vld [vmem:[#allocation5 + $0x14] ss:$8 sps:$4 sm:$0xff]   ;;  %v765_v4 = vld [vmem:[#allocation5 + $0x10] ss:$8 sps:$4 sm:$0xff]  }
  0x38   :  { %184 = vmatpush1.bf16.msra.mxu0 %v762_v2  ;;  %v766_v5 = vld [vmem:[#allocation5 + $0x24] ss:$8 sps:$4 sm:$0xff]   ;;  %v768_v6 = vld [vmem:[#allocation5 + $0x20] ss:$8 sps:$4 sm:$0xff]   ;;  %v769_v7 = vld [vmem:[#allocation5 + $0x34] ss:$8 sps:$4 sm:$0xff]  }
  0x39   :  { %185 = vmatprep.subr.bf16.mxu0 %v763_v3  ;;  %v771_v8 = vld [vmem:[#allocation5 + $0x30] ss:$8 sps:$4 sm:$0xff]   ;;  %v772_v9 = vld [vmem:[#allocation5 + $0x44] ss:$8 sps:$4 sm:$0xff]   ;;  %v786_v11 = vld [vmem:[#allocation7] ss:$8 sps:$4 sm:$0xff]  }
  0x3a   :  { %v784_v10 = vld [vmem:[#allocation7 + $0x4] ss:$8 sps:$4 sm:$0xff]   ;;  %v774_v12 = vld [vmem:[#allocation5 + $0x40] ss:$8 sps:$4 sm:$0xff]   ;;  %v787_v13 = vld [vmem:[#allocation7 + $0x14] ss:$8 sps:$4 sm:$0xff]  }
  0x3b   :  { %v775_v14 = vld [vmem:[#allocation5 + $0x54] ss:$8 sps:$4 sm:$0xff]   ;;  %580 = vmatprep.subr.bf16.mxu1 %v784_v10  ;;  %v789_v15 = vld [vmem:[#allocation7 + $0x10] ss:$8 sps:$4 sm:$0xff]   ;;  %v790_v16 = vld [vmem:[#allocation7 + $0x24] ss:$8 sps:$4 sm:$0xff]  }
  0x3c   :  { %186 = vmatpush1.bf16.msra.mxu0 %v765_v4  ;;  %581 = vmatpush1.bf16.msra.mxu1 %v786_v11  ;;  %v777_v17 = vld [vmem:[#allocation5 + $0x50] ss:$8 sps:$4 sm:$0xff]   ;;  %v778_v18 = vld [vmem:[#allocation5 + $0x64] ss:$8 sps:$4 sm:$0xff]   ;;  %v792_v19 = vld [vmem:[#allocation7 + $0x20] ss:$8 sps:$4 sm:$0xff]  }
  0x3d   :  { %187 = vmatprep.subr.bf16.mxu0 %v766_v5  ;;  %582 = vmatprep.subr.bf16.mxu1 %v787_v13  ;;  %v780_v20 = vld [vmem:[#allocation5 + $0x60] ss:$8 sps:$4 sm:$0xff]   ;;  %v781_v21 = vld [vmem:[#allocation5 + $0x74] ss:$8 sps:$4 sm:$0xff]   ;;  %v795_v23 = vld [vmem:[#allocation7 + $0x30] ss:$8 sps:$4 sm:$0xff]  }
  0x3e   :  { %v793_v22 = vld [vmem:[#allocation7 + $0x34] ss:$8 sps:$4 sm:$0xff]   ;;  %v796_v24 = vld [vmem:[#allocation7 + $0x44] ss:$8 sps:$4 sm:$0xff]   ;;  %v783_v25 = vld [vmem:[#allocation5 + $0x70] ss:$8 sps:$4 sm:$0xff]  }
  0x3f   :  { %v63_v26 = vld [vmem:[#allocation2] sm:$0xff]  ;;  %v64_v27 = vld [vmem:[#allocation2 + $0x8] sm:$0xff]  ;;  %v799_v30 = vld [vmem:[#allocation7 + $0x54] ss:$8 sps:$4 sm:$0xff]   ;;  %v1085_v62 = vshrl.u32 %v93_v61, 7 }
  0x40   :  { %188 = vmatpush1.bf16.msra.mxu0 %v768_v6  ;;  %583 = vmatpush1.bf16.msra.mxu1 %v789_v15  ;;  %v798_v28 = vld [vmem:[#allocation7 + $0x40] ss:$8 sps:$4 sm:$0xff]   ;;  %v71_v29 = vpack.c.bf16 %v64_v27, %v63_v26  ;;  %v801_v31 = vld [vmem:[#allocation7 + $0x50] ss:$8 sps:$4 sm:$0xff]   ;;  %v802_v32 = vld [vmem:[#allocation7 + $0x64] ss:$8 sps:$4 sm:$0xff]  }
  0x41   :  { %189 = vmatprep.subr.bf16.mxu0 %v769_v7  ;;  %584 = vmatprep.subr.bf16.mxu1 %v790_v16  ;;  %v66_v34 = vld [vmem:[#allocation2 + $0x18] sm:$0xff]  ;;  %v804_v35 = vld [vmem:[#allocation7 + $0x60] ss:$8 sps:$4 sm:$0xff]   ;;  %v69_v40 = vld [vmem:[#allocation2 + $0x30] sm:$0xff]  ;;  %v95_v63 = vsub.s32 0, %v1085_v62  ;;  %v99_v1 = vsub.s32 1, %v1085_v62 }
  0x42   :  { %v72_v36 = vpack.c.bf16 %v66_v34, %v65_v33  ;;  %v67_v37 = vld [vmem:[#allocation2 + $0x20] sm:$0xff]  ;;  %v68_v38 = vld [vmem:[#allocation2 + $0x28] sm:$0xff]  ;;  %v70_v41 = vld [vmem:[#allocation2 + $0x38] sm:$0xff] }
  0x43   :  { %v73_v39 = vpack.c.bf16 %v68_v38, %v67_v37  ;;  %v74_v42 = vpack.c.bf16 %v70_v41, %v69_v40  ;;  %v805_v43 = vld [vmem:[#allocation7 + $0x74] ss:$8 sps:$4 sm:$0xff]   ;;  %v807_v44 = vld [vmem:[#allocation7 + $0x70] ss:$8 sps:$4 sm:$0xff]   ;;  %v808_v45 = vld [vmem:[#allocation7 + $0x84] ss:$8 sps:$4 sm:$0xff]  }
  0x44   :  { %190 = vmatpush1.bf16.msra.mxu0 %v771_v8  ;;  %585 = vmatpush1.bf16.msra.mxu1 %v792_v19  ;;  %v810_v46 = vld [vmem:[#allocation7 + $0x80] ss:$8 sps:$4 sm:$0xff]   ;;  %v811_v47 = vld [vmem:[#allocation7 + $0x94] ss:$8 sps:$4 sm:$0xff]   ;;  %v813_v48 = vld [vmem:[#allocation7 + $0x90] ss:$8 sps:$4 sm:$0xff]  }
  0x45   :  { %191 = vmatprep.subr.bf16.mxu0 %v772_v9  ;;  %586 = vmatprep.subr.bf16.mxu1 %v793_v22  ;;  %v814_v49 = vld [vmem:[#allocation7 + $0xa4] ss:$8 sps:$4 sm:$0xff]   ;;  %v816_v50 = vld [vmem:[#allocation7 + $0xa0] ss:$8 sps:$4 sm:$0xff]   ;;  %v817_v51 = vld [vmem:[#allocation7 + $0xb4] ss:$8 sps:$4 sm:$0xff]  }
  0x46   :  { %v819_v52 = vld [vmem:[#allocation7 + $0xb0] ss:$8 sps:$4 sm:$0xff]   ;;  %v820_v53 = vld [vmem:[#allocation7 + $0xc4] ss:$8 sps:$4 sm:$0xff]   ;;  %v822_v54 = vld [vmem:[#allocation7 + $0xc0] ss:$8 sps:$4 sm:$0xff]  }
  0x47   :  { %v823_v55 = vld [vmem:[#allocation7 + $0xd4] ss:$8 sps:$4 sm:$0xff]   ;;  %v825_v56 = vld [vmem:[#allocation7 + $0xd0] ss:$8 sps:$4 sm:$0xff]   ;;  %v826_v57 = vld [vmem:[#allocation7 + $0xe4] ss:$8 sps:$4 sm:$0xff]  }
  0x48   :  { %192 = vmatpush1.bf16.msra.mxu0 %v774_v12  ;;  %587 = vmatpush1.bf16.msra.mxu1 %v795_v23  ;;  %v828_v58 = vld [vmem:[#allocation7 + $0xe0] ss:$8 sps:$4 sm:$0xff]   ;;  %v829_v59 = vld [vmem:[#allocation7 + $0xf4] ss:$8 sps:$4 sm:$0xff]   ;;  %v831_v60 = vld [vmem:[#allocation7 + $0xf0] ss:$8 sps:$4 sm:$0xff]  }
  0x49   :  { %193 = vmatprep.subr.bf16.mxu0 %v775_v14  ;;  %588 = vmatprep.subr.bf16.mxu1 %v796_v24 }
  0x4c   :  { %194 = vmatpush1.bf16.msra.mxu0 %v777_v17  ;;  %589 = vmatpush1.bf16.msra.mxu1 %v798_v28 }
  0x4d   :  { %195 = vmatprep.subr.bf16.mxu0 %v778_v18  ;;  %590 = vmatprep.subr.bf16.mxu1 %v799_v30 }
  0x50   :  { %196 = vmatpush1.bf16.msra.mxu0 %v780_v20  ;;  %591 = vmatpush1.bf16.msra.mxu1 %v801_v31 }
  0x51   :  { %197 = vmatprep.subr.bf16.mxu0 %v781_v21  ;;  %592 = vmatprep.subr.bf16.mxu1 %v802_v32 }
  0x54   :  { %198 = vmatpush1.bf16.msra.mxu0 %v783_v25  ;;  %593 = vmatpush1.bf16.msra.mxu1 %v804_v35 }
  0x55   :  { %594 = vmatprep.subr.bf16.mxu1 %v805_v43 }
  0x57   :  { %216 = vmatmul.mubr.bf16.vlgmr.msra.gmra.mrb[0].mxu0 %v71_v29 }
  0x58   :  { %225 = vmatprep.mubr.bf16.mxu0 %v995_v0  ;;  %595 = vmatpush1.bf16.msra.mxu1 %v807_v44 }
  0x59   :  { %596 = vmatprep.subr.bf16.mxu1 %v808_v45 }
  0x5c   :  { %597 = vmatpush1.bf16.msra.mxu1 %v810_v46 }
  0x5d   :  { %598 = vmatprep.subr.bf16.mxu1 %v811_v47 }
  0x5f   :  { %226 = vmatmul.mubr.bf16.gmra.mrb[4].mxu0 %v72_v36 }
  0x60   :  { %235 = vmatprep.mubr.bf16.mxu0 %v995_v0  ;;  %599 = vmatpush1.bf16.msra.mxu1 %v813_v48 }
  0x61   :  { %600 = vmatprep.subr.bf16.mxu1 %v814_v49 }
  0x64   :  { %601 = vmatpush1.bf16.msra.mxu1 %v816_v50 }
  0x65   :  { %602 = vmatprep.subr.bf16.mxu1 %v817_v51 }
  0x67   :  { %236 = vmatmul.mubr.bf16.gmra.mrb[8].mxu0 %v73_v39 }
  0x68   :  { %245 = vmatprep.mubr.bf16.mxu0 %v995_v0  ;;  %603 = vmatpush1.bf16.msra.mxu1 %v819_v52  ;;  %v91_v0 = vld [vmem:[%s1201_s2] sm:$0x3] }
  0x69   :  { %604 = vmatprep.subr.bf16.mxu1 %v820_v53  ;;  %v1094_v2 = vrot.slane %v91_v0, %v95_v63  ;;  %v1098_v3 = vrot.slane %v91_v0, %v99_v1 }
  0x6c   :  { %605 = vmatpush1.bf16.msra.mxu1 %v822_v54 }
  0x6d   :  { %606 = vmatprep.subr.bf16.mxu1 %v823_v55 }
  0x6f   :  { %246 = vmatmul.mubr.bf16.gmra.mrb[12].mxu0 %v74_v42 }
  0x70   :  { %607 = vmatpush1.bf16.msra.mxu1 %v825_v56 }
  0x71   :  { %608 = vmatprep.subr.bf16.mxu1 %v826_v57 }
  0x74   :  { %609 = vmatpush1.bf16.msra.mxu1 %v828_v58 }
  0x75   :  { %610 = vmatprep.subr.bf16.mxu1 %v829_v59 }
  0x78   :  { %611 = vmatpush1.bf16.msra.mxu1 %v831_v60 }
 0x12a   :  { %v217_v4 = vpop.f32.mrb[0].mxu0 }
 0x12b   :  { %v1101_v5 = vadd.f32 %v217_v4, %v1094_v2  ;;  %v219_v6 = vpop.f32.mrb[1].mxu0 }
 0x12c   :  { %v1104_v7 = vadd.f32 %v219_v6, %v1098_v3  ;;  %v221_v8 = vpop.f32.mrb[2].mxu0 }
 0x12d   :  { %v703_v9 = vmul.f32 -1.442695, %v1101_v5  ;;  %v1108_v10 = vadd.f32 %v221_v8, %v1094_v2  ;;  %v223_v11 = vpop.f32.mrb[3].mxu0 }
 0x12e   :  { %v704_v12 = vmul.f32 -1.442695, %v1104_v7  ;;  %v1112_v13 = vadd.f32 %v223_v11, %v1098_v3 }
 0x12f   :  { %832 = vpow2.f32 %v703_v9  ;;  %v705_v14 = vmul.f32 -1.442695, %v1108_v10 }
 0x130   :  { %834 = vpow2.f32 %v704_v12  ;;  %v706_v15 = vmul.f32 -1.442695, %v1112_v13 }
 0x131   :  { %836 = vpow2.f32 %v705_v14 }
 0x132   :  { %838 = vpow2.f32 %v706_v15  ;;  %v227_v16 = vpop.f32.mrb[4].mxu0 }
 0x133   :  { %v1117_v17 = vadd.f32 %v227_v16, %v1094_v2  ;;  %v229_v18 = vpop.f32.mrb[5].mxu0 }
 0x134   :  { %v1120_v19 = vadd.f32 %v229_v18, %v1098_v3  ;;  %v231_v20 = vpop.f32.mrb[6].mxu0 }
 0x135   :  { %v707_v21 = vmul.f32 -1.442695, %v1117_v17  ;;  %v1124_v22 = vadd.f32 %v231_v20, %v1094_v2  ;;  %v233_v23 = vpop.f32.mrb[7].mxu0 }
 0x136   :  { %v708_v24 = vmul.f32 -1.442695, %v1120_v19  ;;  %v1128_v25 = vadd.f32 %v233_v23, %v1098_v3 }
 0x137   :  { %840 = vpow2.f32 %v707_v21  ;;  %v709_v26 = vmul.f32 -1.442695, %v1124_v22 }
 0x138   :  { %842 = vpow2.f32 %v708_v24  ;;  %v710_v27 = vmul.f32 -1.442695, %v1128_v25 }
 0x139   :  { %v833_v28 = vpop.eup %832  ;;  %844 = vpow2.f32 %v709_v26 }
 0x13a   :  { %v835_v29 = vpop.eup %834  ;;  %v304_v30 = vadd.f32 1.0, %v833_v28  ;;  %846 = vpow2.f32 %v710_v27  ;;  %v237_v31 = vpop.f32.mrb[8].mxu0 }
 0x13b   :  { %v837_v32 = vpop.eup %836  ;;  %v305_v33 = vadd.f32 1.0, %v835_v29  ;;  %v1133_v34 = vadd.f32 %v237_v31, %v1094_v2  ;;  %v239_v35 = vpop.f32.mrb[9].mxu0 }
 0x13c   :  { %v839_v36 = vpop.eup %838  ;;  %848 = vrcp.f32 %v304_v30  ;;  %v306_v37 = vadd.f32 1.0, %v837_v32  ;;  %v1136_v38 = vadd.f32 %v239_v35, %v1098_v3  ;;  %v241_v39 = vpop.f32.mrb[10].mxu0 }
 0x13d   :  { %850 = vrcp.f32 %v305_v33  ;;  %v307_v40 = vadd.f32 1.0, %v839_v36  ;;  %v711_v41 = vmul.f32 -1.442695, %v1133_v34  ;;  %v1140_v42 = vadd.f32 %v241_v39, %v1094_v2  ;;  %v243_v43 = vpop.f32.mrb[11].mxu0 }
 0x13e   :  { %852 = vrcp.f32 %v306_v37  ;;  %v712_v44 = vmul.f32 -1.442695, %v1136_v38  ;;  %v1144_v45 = vadd.f32 %v243_v43, %v1098_v3 }
 0x13f   :  { %854 = vrcp.f32 %v307_v40  ;;  %v713_v46 = vmul.f32 -1.442695, %v1140_v42 }
 0x140   :  { %856 = vpow2.f32 %v711_v41  ;;  %v714_v47 = vmul.f32 -1.442695, %v1144_v45 }
 0x141   :  { %v841_v48 = vpop.eup %840  ;;  %858 = vpow2.f32 %v712_v44 }
 0x142   :  { %v843_v49 = vpop.eup %842  ;;  %v308_v50 = vadd.f32 1.0, %v841_v48  ;;  %860 = vpow2.f32 %v713_v46  ;;  %v247_v51 = vpop.f32.mrb[12].mxu0 }
 0x143   :  { %v845_v52 = vpop.eup %844  ;;  %v309_v53 = vadd.f32 1.0, %v843_v49  ;;  %862 = vpow2.f32 %v714_v47  ;;  %v1149_v54 = vadd.f32 %v247_v51, %v1094_v2  ;;  %v249_v55 = vpop.f32.mrb[13].mxu0 }
 0x144   :  { %v847_v56 = vpop.eup %846  ;;  %864 = vrcp.f32 %v308_v50  ;;  %v310_v57 = vadd.f32 1.0, %v845_v52  ;;  %v1152_v58 = vadd.f32 %v249_v55, %v1098_v3  ;;  %v251_v59 = vpop.f32.mrb[14].mxu0 }
 0x145   :  { %866 = vrcp.f32 %v309_v53  ;;  %v311_v60 = vadd.f32 1.0, %v847_v56  ;;  %v715_v61 = vmul.f32 -1.442695, %v1149_v54  ;;  %v1156_v0 = vadd.f32 %v251_v59, %v1094_v2  ;;  %v253_v4 = vpop.f32.mrb[15].mxu0 }
 0x146   :  { %v849_v6 = vpop.eup %848  ;;  %868 = vrcp.f32 %v310_v57  ;;  %v716_v8 = vmul.f32 -1.442695, %v1152_v58  ;;  %v1160_v9 = vadd.f32 %v253_v4, %v1098_v3 }
 0x147   :  { %v851_v11 = vpop.eup %850  ;;  %870 = vrcp.f32 %v311_v60  ;;  %v717_v12 = vmul.f32 -1.442695, %v1156_v0  ;;  %v352_v2 = vmul.f32 %v849_v6, %v1101_v5 }
 0x148   :  { %v853_v14 = vpop.eup %852  ;;  %872 = vpow2.f32 %v715_v61  ;;  %v718_v15 = vmul.f32 -1.442695, %v1160_v9  ;;  %v353_v21 = vmul.f32 %v851_v11, %v1104_v7 }
 0x149   :  { %v855_v16 = vpop.eup %854  ;;  %v354_v18 = vmul.f32 %v853_v14, %v1108_v10  ;;  %874 = vpow2.f32 %v716_v8 }
 0x14a   :  { %v857_v20 = vpop.eup %856  ;;  %876 = vpow2.f32 %v717_v12  ;;  %v355_v3 = vmul.f32 %v855_v16, %v1112_v13 }
 0x14b   :  { %v859_v23 = vpop.eup %858  ;;  %v312_v24 = vadd.f32 1.0, %v857_v20  ;;  %878 = vpow2.f32 %v718_v15  ;;  %v368_v26 = vpack.c.bf16 %v354_v18, %v352_v2 }
 0x14c   :  { %v861_v27 = vpop.eup %860  ;;  %v313_v28 = vadd.f32 1.0, %v859_v23  ;;  %v369_v29 = vpack.c.bf16 %v355_v3, %v353_v21 }
 0x14d   :  { %v863_v30 = vpop.eup %862  ;;  %880 = vrcp.f32 %v312_v24  ;;  %v314_v31 = vadd.f32 1.0, %v861_v27 }
 0x14e   :  { %v865_v5 = vpop.eup %864  ;;  %882 = vrcp.f32 %v313_v28  ;;  %v315_v10 = vadd.f32 1.0, %v863_v30  ;;  %612 = vmatprep.mubr.bf16.mxu1 %v369_v29 }
 0x14f   :  { %v867_v32 = vpop.eup %866  ;;  %884 = vrcp.f32 %v314_v31  ;;  %613 = vmatmul.mubr.bf16.vlgmr.msra.gmra.mrb[0].mxu1 %v368_v26  ;;  %v356_v33 = vmul.f32 %v865_v5, %v1117_v17 }
 0x150   :  { %v869_v7 = vpop.eup %868  ;;  %886 = vrcp.f32 %v315_v10  ;;  %v357_v37 = vmul.f32 %v867_v32, %v1120_v19 }
 0x151   :  { %v871_v13 = vpop.eup %870  ;;  %v358_v35 = vmul.f32 %v869_v7, %v1124_v22 }
 0x152   :  { %v873_v36 = vpop.eup %872  ;;  %v359_v39 = vmul.f32 %v871_v13, %v1128_v25 }
 0x153   :  { %v875_v40 = vpop.eup %874  ;;  %v316_v41 = vadd.f32 1.0, %v873_v36  ;;  %v370_v43 = vpack.c.bf16 %v358_v35, %v356_v33 }
 0x154   :  { %v877_v44 = vpop.eup %876  ;;  %v317_v46 = vadd.f32 1.0, %v875_v40  ;;  %v371_v47 = vpack.c.bf16 %v359_v39, %v357_v37 }
 0x155   :  { %v879_v48 = vpop.eup %878  ;;  %888 = vrcp.f32 %v316_v41  ;;  %v318_v49 = vadd.f32 1.0, %v877_v44 }
 0x156   :  { %890 = vrcp.f32 %v317_v46  ;;  %v319_v50 = vadd.f32 1.0, %v879_v48  ;;  %622 = vmatprep.mubr.bf16.mxu1 %v371_v47 }
 0x157   :  { %v881_v17 = vpop.eup %880  ;;  %892 = vrcp.f32 %v318_v49  ;;  %623 = vmatmul.mubr.bf16.gmra.mrb[4].mxu1 %v370_v43 }
 0x158   :  { %v883_v22 = vpop.eup %882  ;;  %894 = vrcp.f32 %v319_v50  ;;  %v360_v25 = vmul.f32 %v881_v17, %v1133_v34 }
 0x159   :  { %v885_v19 = vpop.eup %884  ;;  %v361_v53 = vmul.f32 %v883_v22, %v1136_v38 }
 0x15a   :  { %v887_v51 = vpop.eup %886  ;;  %v362_v52 = vmul.f32 %v885_v19, %v1140_v42 }
 0x15b   :  { %v363_v55 = vmul.f32 %v887_v51, %v1144_v45  ;;  %v408_v45 = vld [vmem:[%s1203_s4] sm:$0x3]  ;;  %s996_s4 = smov [#allocation8]  }
 0x15c   :  { %v372_v56 = vpack.c.bf16 %v362_v52, %v360_v25  ;;  %v413_v12 = vrot.slane %v408_v45, %v95_v63  ;;  %s674_s6 = sshll.u32 %s996_s4, 4  ;;  %s675_s6 = int_to_ptr.vmem [resolvable:$true] %s674_s6 }
 0x15d   :  { %v373_v57 = vpack.c.bf16 %v363_v55, %v361_v53  ;;  %s962_s7 = scalar_lea.vmem %s675_s6, 2048  ;;  %p967_p11 = scmp.lt.s32.totalorder %s675_s6, %s675_s6 }
 0x15e   :  { %p963_p10 = scmp.ne.s32.totalorder %s675_s6, %s962_s7  ;;  %p968_p12 = scmp.lt.s32.totalorder %s962_s7, %s962_s7 }
 0x15f   :  { %v889_v59 = vpop.eup %888  ;;  %632 = vmatprep.mubr.bf16.mxu1 %v373_v57 }
 0x160   :  { %v891_v60 = vpop.eup %890  ;;  %633 = vmatmul.mubr.bf16.gmra.mrb[8].mxu1 %v372_v56  ;;  %v364_v6 = vmul.f32 %v889_v59, %v1149_v54  ;;  %v417_v54 = vrot.slane %v408_v45, %v99_v1  ;;  %p969_p13 = por %p968_p12, %p967_p11 }
 0x161   :  { %v893_v61 = vpop.eup %892  ;;  %v365_v34 = vmul.f32 %v891_v60, %v1152_v58 }
 0x162   :  { %v895_v4 = vpop.eup %894  ;;  %v366_v8 = vmul.f32 %v893_v61, %v1156_v0  ;;  %p970_p0 = pnand %p969_p13, %p963_p10 }
 0x163   :  { %v367_v42 = vmul.f32 %v895_v4, %v1160_v9 }
 0x164   :  { %v374_v11 = vpack.c.bf16 %v366_v8, %v364_v6 }
 0x165   :  { %v375_v38 = vpack.c.bf16 %v367_v42, %v365_v34 }
 0x167   :  { %642 = vmatprep.mubr.bf16.mxu1 %v375_v38 }
 0x168   :  { %643 = vmatmul.mubr.bf16.gmra.mrb[12].mxu1 %v374_v11 }
 0x222   :  { %v614_v14 = vpop.f32.mrb[0].mxu1 }
 0x223   :  { %v615_v0 = vadd.f32 %v614_v14, %v413_v12  ;;  %v616_v15 = vpop.f32.mrb[1].mxu1 }
 0x224   :  { %v617_v58 = vadd.f32 %v616_v15, %v417_v54  ;;  %v618_v16 = vpop.f32.mrb[2].mxu1 }
 0x225   :  { %653 = vst [vmem:[#allocation8] sm:$0xff] %v615_v0  ;;  %v619_v9 = vadd.f32 %v618_v16, %v413_v12  ;;  %v620_v2 = vpop.f32.mrb[3].mxu1 }
 0x226   :  { %654 = vst [vmem:[#allocation8 + $0x8] sm:$0xff] %v617_v58  ;;  %v621_v18 = vadd.f32 %v620_v2, %v417_v54 }
 0x227   :  { %655 = vst [vmem:[#allocation8 + $0x10] sm:$0xff] %v619_v9 }
 0x228   :  { %656 = vst [vmem:[#allocation8 + $0x18] sm:$0xff] %v621_v18 }
 0x22a   :  { %v624_v20 = vpop.f32.mrb[4].mxu1 }
 0x22b   :  { %v625_v21 = vadd.f32 %v624_v20, %v413_v12  ;;  %v626_v3 = vpop.f32.mrb[5].mxu1 }
 0x22c   :  { %v627_v23 = vadd.f32 %v626_v3, %v417_v54  ;;  %v628_v63 = vpop.f32.mrb[6].mxu1 }
 0x22d   :  { %657 = vst [vmem:[#allocation8 + $0x20] sm:$0xff] %v625_v21  ;;  %v629_v62 = vadd.f32 %v628_v63, %v413_v12  ;;  %v630_v1 = vpop.f32.mrb[7].mxu1 }
 0x22e   :  { %658 = vst [vmem:[#allocation8 + $0x28] sm:$0xff] %v627_v23  ;;  %v631_v24 = vadd.f32 %v630_v1, %v417_v54 }
 0x22f   :  { %659 = vst [vmem:[#allocation8 + $0x30] sm:$0xff] %v629_v62 }
 0x230   :  { %660 = vst [vmem:[#allocation8 + $0x38] sm:$0xff] %v631_v24 }
 0x233   :  { %v634_v26 = vpop.f32.mrb[8].mxu1 }
 0x234   :  { %v635_v27 = vadd.f32 %v634_v26, %v413_v12  ;;  %v636_v28 = vpop.f32.mrb[9].mxu1 }
 0x235   :  { %v637_v29 = vadd.f32 %v636_v28, %v417_v54  ;;  %v638_v30 = vpop.f32.mrb[10].mxu1 }
 0x236   :  { %661 = vst [vmem:[#allocation8 + $0x40] sm:$0xff] %v635_v27  ;;  %v639_v31 = vadd.f32 %v638_v30, %v413_v12  ;;  %v640_v5 = vpop.f32.mrb[11].mxu1 }
 0x237   :  { %662 = vst [vmem:[#allocation8 + $0x48] sm:$0xff] %v637_v29  ;;  %v641_v10 = vadd.f32 %v640_v5, %v417_v54 }
 0x238   :  { %663 = vst [vmem:[#allocation8 + $0x50] sm:$0xff] %v639_v31 }
 0x239   :  { %664 = vst [vmem:[#allocation8 + $0x58] sm:$0xff] %v641_v10 }
 0x23b   :  { %v644_v32 = vpop.f32.mrb[12].mxu1 }
 0x23c   :  { %v645_v7 = vadd.f32 %v644_v32, %v413_v12  ;;  %v646_v13 = vpop.f32.mrb[13].mxu1 }
 0x23d   :  { %v647_v33 = vadd.f32 %v646_v13, %v417_v54  ;;  %v648_v35 = vpop.f32.mrb[14].mxu1 }
 0x23e   :  { %665 = vst [vmem:[#allocation8 + $0x60] sm:$0xff] %v645_v7  ;;  %v649_v36 = vadd.f32 %v648_v35, %v413_v12  ;;  %v650_v37 = vpop.f32.mrb[15].mxu1 }
 0x23f   :  { %666 = vst [vmem:[#allocation8 + $0x68] sm:$0xff] %v647_v33  ;;  %v651_v39 = vadd.f32 %v650_v37, %v417_v54 }
 0x240   :  { %667 = vst [vmem:[#allocation8 + $0x70] sm:$0xff] %v649_v36 }
 0x241   :  { %668 = vst [vmem:[#allocation8 + $0x78] sm:$0xff] %v651_v39 }
 0x242   :  { %973 = shalt.err (!%p970_p0)
}
 0x243   :  { %s974_s10 = scalar_lea.hbm %s1204_s5, 2048 }
 0x244   :  { %p975_p1 = scmp.ne.s32.totalorder %s1204_s5, %s974_s10  ;;  %p978_p2 = scmp.lt.u32.totalorder %s974_s10, %s1204_s5 }
 0x246   :  { %p980_p3 = pnand %p978_p2, %p975_p1 }
 0x248   :  { %983 = shalt.err (!%p980_p3)
}
 0x249   :  { %s997_s15 = smov 256   ;;  %s998_s16 = smov 16  }
 0x24a   :  { %680 = dma.vmem_to_hbm [thread:$0]  %s675_s6, 2048, %s1204_s5, [#allocation4], %s997_s15, %s997_s15, %s998_s16  }
 0x24b   :  { %988 = dma.done.wait [#allocation4], 2048  }
 0x24c   :  { %989 = vsyncadd [#allocation4], 4294965248 }
 0x24d   :  { %684 = vsyncpa [#allocation3], 1 }
 0x24e   :  { %685 = vsyncpa [#allocation6], 1 }
 0x24f   :  { %686 = vsyncpa [#allocation4], 1 }

</bundles_post_ra>
